<compile_context>
chip_gen: v7x
topology: tpu7x:2x2x1
jax: 0.10.0
libtpu: 0.0.40
codegen_flags: <defaults>
</compile_context>

<pallas_src>
import math

import jax
import jax.numpy as jnp
from jax import lax
from jax.experimental import pallas as pl
from jax.experimental.pallas import tpu as pltpu


def _round_up(x, m):
    return ((x + m - 1) // m) * m


def _pick_time_block(T, cap=16):
    """Largest divisor of T that is <= cap (timesteps per grid step)."""
    for ts in range(min(cap, T), 0, -1):
        if T % ts == 0:
            return ts
    return 1


# ----------------------------------------------------------------------------
# Kernel 1: tiled matmul with fused bias:  out = A @ B + bias
# Used both for the hoisted input projection and for the output decode.
# ----------------------------------------------------------------------------
def _matmul_bias_kernel(a_ref, b_ref, bias_ref, o_ref, acc_ref):
    @pl.when(pl.program_id(2) == 0)
    def _():
        acc_ref[...] = jnp.zeros_like(acc_ref)

    acc_ref[...] += jnp.dot(a_ref[...], b_ref[...],
                            preferred_element_type=jnp.float32)

    @pl.when(pl.program_id(2) == pl.num_programs(2) - 1)
    def _():
        o_ref[...] = (acc_ref[...] + bias_ref[...]).astype(o_ref.dtype)


def matmul_bias(a, b, bias=None, *, tm=256, tn=256, tk=256,
                vmem_limit_bytes=48 * 1024 * 1024):
    """a: (M, K) f32, b: (K, N) f32 (already transposed), bias: (N,) or None."""
    M, K = a.shape
    K2, N = b.shape
    assert K == K2
    if bias is None:
        bias = jnp.zeros((N,), jnp.float32)

    # 256-multiple tiles (v6e/v7x MXU width); clamp for small problems so every
    # block is either (8,128)-aligned or covers the full (padded) dim.
    tm = min(tm, _round_up(M, 8))
    tn = min(tn, _round_up(N, 128))
    tk = min(tk, _round_up(K, 128))
    Mp, Np, Kp = _round_up(M, tm), _round_up(N, tn), _round_up(K, tk)

    a_p = jnp.pad(a, ((0, Mp - M), (0, Kp - K)))
    b_p = jnp.pad(b, ((0, Kp - K), (0, Np - N)))
    bias_p = jnp.pad(bias.reshape(1, N).astype(jnp.float32),
                     ((0, 0), (0, Np - N)))

    out = pl.pallas_call(
        _matmul_bias_kernel,
        out_shape=jax.ShapeDtypeStruct((Mp, Np), jnp.float32),
        grid_spec=pltpu.PrefetchScalarGridSpec(
            num_scalar_prefetch=0,
            grid=(Mp // tm, Np // tn, Kp // tk),
            in_specs=[
                pl.BlockSpec((tm, tk), lambda i, j, k: (i, k)),   # A tile
                pl.BlockSpec((tk, tn), lambda i, j, k: (k, j)),   # B tile
                pl.BlockSpec((1, tn), lambda i, j, k: (0, j)),    # bias tile
            ],
            out_specs=pl.BlockSpec((tm, tn), lambda i, j, k: (i, j)),
            scratch_shapes=[pltpu.VMEM((tm, tn), jnp.float32)],
        ),
        compiler_params=pltpu.CompilerParams(
            dimension_semantics=("parallel", "parallel", "arbitrary"),
            vmem_limit_bytes=vmem_limit_bytes),
    )(a_p, b_p, bias_p)
    return out[:M, :N]


# ----------------------------------------------------------------------------
# Kernel 2: single-layer LSTM recurrence (PyTorch gate order: i, f, g, o).
# Gate inputs (x @ W_ih^T + b_ih + b_hh) are precomputed, so the serial loop
# only does h @ W_hh + gates. Several timesteps are processed per grid step;
# h/c live in VMEM scratch across grid steps (grid axis is "arbitrary").
# ----------------------------------------------------------------------------
def _lstm_kernel(gx_ref, whh_ref, h0_ref, c0_ref, hid_ref, h_sc, c_sc):
    @pl.when(pl.program_id(0) == 0)
    def _():
        h_sc[...] = h0_ref[...]
        c_sc[...] = c0_ref[...]

    w_hh = whh_ref[...]                      # (H, 4H), pre-transposed, resident
    H = h_sc.shape[-1]
    n_steps = hid_ref.shape[0]               # timesteps in this block (static)

    def step(s, carry):
        h, c = carry
        gates = gx_ref[s] + jnp.dot(h, w_hh,
                                    preferred_element_type=jnp.float32)
        # NOTE: for production, pick H as a multiple of 128 so these gate
        # slices are lane-aligned (H=32 here is a toy size).
        ingate = jax.nn.sigmoid(gates[:, 0 * H:1 * H])
        forgetgate = jax.nn.sigmoid(gates[:, 1 * H:2 * H])
        cellgate = jnp.tanh(gates[:, 2 * H:3 * H])
        outgate = jax.nn.sigmoid(gates[:, 3 * H:4 * H])
        c_new = forgetgate * c + ingate * cellgate
        h_new = outgate * jnp.tanh(c_new)
        hid_ref[s] = h_new.astype(hid_ref.dtype)
        return h_new, c_new

    h, c = lax.fori_loop(0, n_steps, step, (h_sc[...], c_sc[...]), unroll=True)
    h_sc[...] = h
    c_sc[...] = c


def lstm_forward(gx_tbh, w_hh_t, h0, c0, *, time_block=None):
    """gx_tbh: (T, B, 4H) precomputed gate inputs. Returns hiddens (T, B, H)."""
    T, B, G = gx_tbh.shape
    H = h0.shape[-1]
    ts = time_block if time_block is not None else _pick_time_block(T)
    assert T % ts == 0
    return pl.pallas_call(
        _lstm_kernel,
        out_shape=jax.ShapeDtypeStruct((T, B, H), jnp.float32),
        grid_spec=pltpu.PrefetchScalarGridSpec(
            num_scalar_prefetch=0,
            grid=(T // ts,),
            in_specs=[
                pl.BlockSpec((ts, B, G), lambda t: (t, 0, 0)),  # gate inputs
                pl.BlockSpec((H, G), lambda t: (0, 0)),         # W_hh^T (resident)
                pl.BlockSpec((B, H), lambda t: (0, 0)),         # h0
                pl.BlockSpec((B, H), lambda t: (0, 0)),         # c0
            ],
            out_specs=pl.BlockSpec((ts, B, H), lambda t: (t, 0, 0)),
            scratch_shapes=[
                pltpu.VMEM((B, H), jnp.float32),   # h carry
                pltpu.VMEM((B, H), jnp.float32),   # c carry
            ],
        ),
        compiler_params=pltpu.CompilerParams(
            dimension_semantics=("arbitrary",)),   # sequential recurrence
    )(gx_tbh, w_hh_t, h0, c0)


# ----------------------------------------------------------------------------
# Model wrapper (parameter init + glue in plain JAX)
# ----------------------------------------------------------------------------
class LSTMHingeOutEmbModelPallas:
    def __init__(self, key, vocab_size, embedding_size, hidden_size):
        self.vocab_size = vocab_size
        self.embedding_size = embedding_size
        self.nhid = hidden_size

        keys = jax.random.split(key, 6)
        stdv = 1.0 / math.sqrt(hidden_size)

        self.embed_weight = jax.random.uniform(
            keys[0], (vocab_size, embedding_size), jnp.float32, -0.1, 0.1)
        self.w_ih = jax.random.uniform(
            keys[1], (4 * hidden_size, embedding_size), jnp.float32, -stdv, stdv)
        self.w_hh = jax.random.uniform(
            keys[2], (4 * hidden_size, hidden_size), jnp.float32, -stdv, stdv)
        self.b_ih = jax.random.uniform(
            keys[3], (4 * hidden_size,), jnp.float32, -stdv, stdv)
        self.b_hh = jax.random.uniform(
            keys[4], (4 * hidden_size,), jnp.float32, -stdv, stdv)
        self.out_embed = jax.random.uniform(
            keys[5], (vocab_size, hidden_size), jnp.float32, -0.1, 0.1)

        # One-time pre-transposed / folded copies (no in-kernel transposes).
        self.w_ih_t = self.w_ih.T              # (E, 4H)
        self.w_hh_t = self.w_hh.T              # (H, 4H)
        self.out_embed_t = self.out_embed.T    # (H, V)
        self.gate_bias = self.b_ih + self.b_hh  # (4H,)

    def init_hidden(self, bsz):
        return (jnp.zeros((bsz, self.nhid), jnp.float32),
                jnp.zeros((bsz, self.nhid), jnp.float32))

    def forward(self, d, hidden):
        # d: (B, T) int32 token indices
        B, T = d.shape
        H = self.nhid
        hx, cx = hidden

        # Embedding lookup, built directly in time-major order by transposing
        # only the tiny int index matrix (no activation-tensor transpose).
        # TODO(synk): embedding gather stays in plain JAX (a Pallas version
        # would need pl.Element-blocked scalar-prefetch gather).
        d_t = d.T                                           # (T, B)
        x_tbe = jnp.take(self.embed_weight, d_t, axis=0)    # (T, B, E)

        # Pad batch to the f32 sublane height so per-step loads/stores and the
        # recurrent matmul rows are full-tile.
        Bp = _round_up(B, 8)
        if Bp != B:
            x_tbe = jnp.pad(x_tbe, ((0, 0), (0, Bp - B), (0, 0)))
            hx_p = jnp.pad(hx, ((0, Bp - B), (0, 0)))
            cx_p = jnp.pad(cx, ((0, Bp - B), (0, 0)))
        else:
            hx_p, cx_p = hx, cx

        # Hoisted input projection for ALL timesteps: one big tiled MXU matmul
        # with the (b_ih + b_hh) bias folded in.
        gx = matmul_bias(x_tbe.reshape(T * Bp, self.embedding_size),
                         self.w_ih_t, self.gate_bias)        # (T*Bp, 4H)
        gx = gx.reshape(T, Bp, 4 * H)

        # Sequential recurrence: only h @ W_hh + gates inside the serial loop.
        hiddens_tbh = lstm_forward(gx, self.w_hh_t, hx_p, cx_p)    # (T, Bp, H)
        hiddens = jnp.transpose(hiddens_tbh[:, :B, :], (1, 0, 2))  # (B, T, H)

        # Output projection hiddens @ out_embed^T (bulk of model FLOPs), tiled.
        decoded = matmul_bias(hiddens.reshape(B * T, H), self.out_embed_t)
        decoded = decoded.reshape(B, T, self.vocab_size)
        return decoded, hiddens


# ----------------------------------------------------------------------------
# Pure-JAX reference mirroring the PyTorch module, for a correctness check.
# ----------------------------------------------------------------------------
def _reference_forward(model, d, hidden):
    hx, cx = hidden
    x = jnp.take(model.embed_weight, d, axis=0)              # (B, T, E)
    B, T, _ = x.shape
    hs = []
    for t in range(T):
        gates = (x[:, t, :] @ model.w_ih.T + model.b_ih
                 + hx @ model.w_hh.T + model.b_hh)
        i, f, g, o = jnp.split(gates, 4, axis=1)
        i = jax.nn.sigmoid(i)
        f = jax.nn.sigmoid(f)
        g = jnp.tanh(g)
        o = jax.nn.sigmoid(o)
        cx = f * cx + i * g
        hx = o * jnp.tanh(cx)
        hs.append(hx)
    hiddens = jnp.stack(hs, axis=1)                           # (B, T, H)
    decoded = hiddens.reshape(B * T, model.nhid) @ model.out_embed.T
    return decoded.reshape(B, T, model.vocab_size), hiddens


# ----------------------------------------------------------------------------
if __name__ == "__main__":
    B, T = 2, 8
    vocab_size, embedding_size, hidden_size = 64, 16, 32

    key = jax.random.PRNGKey(0)
    k_param, k_data = jax.random.split(key)

    model = LSTMHingeOutEmbModelPallas(
        k_param, vocab_size, embedding_size, hidden_size)

    d = jax.random.randint(k_data, (B, T), 0, vocab_size, dtype=jnp.int32)
    hidden = model.init_hidden(B)

    decoded, hiddens = model.forward(d, hidden)
    jax.block_until_ready((decoded, hiddens))

    assert decoded.shape == (B, T, vocab_size)
    assert hiddens.shape == (B, T, hidden_size)

    ref_decoded, ref_hiddens = _reference_forward(model, d, hidden)
    assert jnp.allclose(hiddens, ref_hiddens, atol=1e-4, rtol=1e-4)
    assert jnp.allclose(decoded, ref_decoded, atol=1e-4, rtol=1e-4)

    print("KERNEL_OK")
</pallas_src>

<mosaic_0001>
module attributes {stable_mosaic.version = 11 : i64} {
  func.func @_matmul_bias_kernel(%arg0: i32, %arg1: i32, %arg2: i32, %arg3: memref<64x128xf32, #tpu.memory_space<vmem>>, %arg4: memref<128x128xf32, #tpu.memory_space<vmem>>, %arg5: memref<1x128xf32, #tpu.memory_space<vmem>>, %arg6: memref<64x128xf32, #tpu.memory_space<vmem>>, %arg7: memref<64x128xf32, #tpu.memory_space<vmem>>) attributes {dimension_semantics = [#tpu.dimension_semantics<parallel>, #tpu.dimension_semantics<parallel>, #tpu.dimension_semantics<arbitrary>], iteration_bounds = array<i64: 1, 1, 1>, scalar_prefetch = 0 : i64, scratch_operands = 1 : i64, tpu.core_type = #tpu.core_type<tc>, window_params = [{transform_indices = @transform_0, window_bounds = array<i64: 64, 128>}, {transform_indices = @transform_1, window_bounds = array<i64: 128, 128>}, {transform_indices = @transform_2, window_bounds = array<i64: 1, 128>}, {transform_indices = @transform_3, window_bounds = array<i64: 64, 128>}]} {
    %c0_i32 = arith.constant 0 : i32
    %0 = arith.cmpi eq, %arg2, %c0_i32 : i32
    %1 = arith.extui %0 : i1 to i32
    %c0_i32_0 = arith.constant 0 : i32
    %2 = arith.cmpi ne, %1, %c0_i32_0 : i32
    scf.if %2 {
      %cst_10 = arith.constant 0.000000e+00 : f32
      %12 = vector.broadcast %cst_10 : f32 to vector<64x128xf32>
      %c0_11 = arith.constant 0 : index
      %c0_12 = arith.constant 0 : index
      %13 = vector.load %arg7[%c0_11, %c0_12] : memref<64x128xf32, #tpu.memory_space<vmem>>, vector<64x128xf32>
      tpu.vector_store %arg7[%c0_11, %c0_12], %12 {strides = array<i32>} : memref<64x128xf32, #tpu.memory_space<vmem>>, vector<64x128xf32>,
    } else {
    }
    %c0 = arith.constant 0 : index
    %c0_1 = arith.constant 0 : index
    %3 = vector.load %arg7[%c0, %c0_1] : memref<64x128xf32, #tpu.memory_space<vmem>>, vector<64x128xf32>
    %c0_2 = arith.constant 0 : index
    %c0_3 = arith.constant 0 : index
    %4 = vector.load %arg3[%c0_2, %c0_3] : memref<64x128xf32, #tpu.memory_space<vmem>>, vector<64x128xf32>
    %c0_4 = arith.constant 0 : index
    %c0_5 = arith.constant 0 : index
    %5 = vector.load %arg4[%c0_4, %c0_5] : memref<128x128xf32, #tpu.memory_space<vmem>>, vector<128x128xf32>
    %cst = arith.constant dense<0.000000e+00> : vector<64x128xf32>
    %6 = tpu.matmul %4, %5, %cst {dimension_numbers = #tpu.dot_dimension_numbers<[1], [0], [0], [1], [0, 0, 1, 1], [], []>} : vector<64x128xf32>, vector<128x128xf32>, vector<64x128xf32> -> vector<64x128xf32>
    %7 = arith.addf %3, %6 : vector<64x128xf32>
    %c0_6 = arith.constant 0 : index
    %c0_7 = arith.constant 0 : index
    %8 = vector.load %arg7[%c0_6, %c0_7] : memref<64x128xf32, #tpu.memory_space<vmem>>, vector<64x128xf32>
    tpu.vector_store %arg7[%c0_6, %c0_7], %7 {strides = array<i32>} : memref<64x128xf32, #tpu.memory_space<vmem>>, vector<64x128xf32>,
    %c0_i32_8 = arith.constant 0 : i32
    %9 = arith.cmpi eq, %arg2, %c0_i32_8 : i32
    %10 = arith.extui %9 : i1 to i32
    %c0_i32_9 = arith.constant 0 : i32
    %11 = arith.cmpi ne, %10, %c0_i32_9 : i32
    scf.if %11 {
      %c0_10 = arith.constant 0 : index
      %c0_11 = arith.constant 0 : index
      %12 = vector.load %arg7[%c0_10, %c0_11] : memref<64x128xf32, #tpu.memory_space<vmem>>, vector<64x128xf32>
      %c0_12 = arith.constant 0 : index
      %c0_13 = arith.constant 0 : index
      %13 = vector.load %arg5[%c0_12, %c0_13] : memref<1x128xf32, #tpu.memory_space<vmem>>, vector<1x128xf32>
      %14 = vector.broadcast %13 : vector<1x128xf32> to vector<64x128xf32>
      %15 = arith.addf %12, %14 : vector<64x128xf32>
      %c0_14 = arith.constant 0 : index
      %c0_15 = arith.constant 0 : index
      %16 = vector.load %arg6[%c0_14, %c0_15] : memref<64x128xf32, #tpu.memory_space<vmem>>, vector<64x128xf32>
      tpu.vector_store %arg6[%c0_14, %c0_15], %15 {strides = array<i32>} : memref<64x128xf32, #tpu.memory_space<vmem>>, vector<64x128xf32>,
    } else {
    }
    return
  }
  func.func @transform_0(%arg0: i32, %arg1: i32, %arg2: i32) -> (i32, i32) {
    %c0_i32 = arith.constant 0 : i32
    return %arg0, %arg2 : i32, i32
  }
  func.func @transform_1(%arg0: i32, %arg1: i32, %arg2: i32) -> (i32, i32) {
    %c0_i32 = arith.constant 0 : i32
    return %arg2, %arg1 : i32, i32
  }
  func.func @transform_2(%arg0: i32, %arg1: i32, %arg2: i32) -> (i32, i32) {
    %c0_i32 = arith.constant 0 : i32
    %c0_i32_0 = arith.constant 0 : i32
    return %c0_i32, %arg1 : i32, i32
  }
  func.func @transform_3(%arg0: i32, %arg1: i32, %arg2: i32) -> (i32, i32) {
    %c0_i32 = arith.constant 0 : i32
    return %arg0, %arg1 : i32, i32
  }
}

</mosaic_0001>

<bundles_post_ra>
// kernel: tpu_custom_call.1
= control target key start
LH: loop header
LB: loop body
LE: loop exit
PB: predicated region body
PF: predicated region fallthrough
CT: control target
= control target key end

     0   :  { %8 = vsyncpa [#allocation4], 0  ;;  %s527_s0 = inlined_call_operand.hbm [shape: f32[64,128], index: 0, kind: input, shape index: {}]   ;;  %s528_s1 = inlined_call_operand.hbm [shape: f32[128,128], index: 1, kind: input, shape index: {}]   ;;  %s529_s2 = inlined_call_operand.vmem [shape: f32[1,128], index: 2, kind: input, shape index: {}]   ;;  %s530_s3 = inlined_call_operand.hbm [shape: f32[64,128], index: 3, kind: output, shape index: {}]  }
   0x1   :  { %9 = vsyncpa [#allocation7], 0 }
   0x2   :  { %10 = vsyncpa [#allocation5], 0  ;;  %s454_s12 = smov [#allocation3]   ;;  %s382_s16 = scalar_lea.hbm %s527_s0, 1024 }
   0x3   :  { %s16_s13 = sshll.u32 %s454_s12, 4  ;;  %p383_p0 = scmp.ne.s32.totalorder %s527_s0, %s382_s16  ;;  %s17_s13 = int_to_ptr.vmem [resolvable:$true] %s16_s13 }
   0x4   :  { %p386_p1 = scmp.lt.u32.totalorder %s382_s16, %s527_s0 }
   0x6   :  { %p388_p2 = pnand %p386_p1, %p383_p0 }
   0x8   :  { %391 = shalt.err (!%p388_p2)
}
   0x9   :  { %s392_s21 = scalar_lea.vmem %s17_s13, 1024  ;;  %p397_p4 = scmp.lt.s32.totalorder %s17_s13, %s17_s13 }
   0xa   :  { %p393_p3 = scmp.ne.s32.totalorder %s17_s13, %s392_s21  ;;  %p398_p5 = scmp.lt.s32.totalorder %s392_s21, %s392_s21 }
   0xc   :  { %p399_p6 = por %p398_p5, %p397_p4 }
   0xe   :  { %p400_p7 = pnand %p399_p6, %p393_p3 }
  0x10   :  { %403 = shalt.err (!%p400_p7)
}
  0x11   :  { %s455_s22 = smov 128   ;;  %s456_s23 = smov 8  }
  0x12   :  { %22 = dma.hbm_to_vmem [thread:$0]  %s527_s0, 1024, %s17_s13, [#allocation4], %s455_s22, %s455_s22, %s456_s23  }
  0x13   :  { %s457_s26 = smov [#allocation6]   ;;  %s404_s30 = scalar_lea.hbm %s528_s1, 2048 }
  0x14   :  { %s28_s27 = sshll.u32 %s457_s26, 4  ;;  %p405_p8 = scmp.ne.s32.totalorder %s528_s1, %s404_s30  ;;  %s29_s27 = int_to_ptr.vmem [resolvable:$true] %s28_s27 }
  0x15   :  { %p408_p9 = scmp.lt.u32.totalorder %s404_s30, %s528_s1 }
  0x17   :  { %p410_p10 = pnand %p408_p9, %p405_p8 }
  0x19   :  { %413 = shalt.err (!%p410_p10)
}
  0x1a   :  { %s414_s8 = scalar_lea.vmem %s29_s27, 2048  ;;  %p419_p12 = scmp.lt.s32.totalorder %s29_s27, %s29_s27 }
  0x1b   :  { %p415_p11 = scmp.ne.s32.totalorder %s29_s27, %s414_s8  ;;  %p420_p13 = scmp.lt.s32.totalorder %s414_s8, %s414_s8 }
  0x1d   :  { %p421_p0 = por %p420_p13, %p419_p12 }
  0x1f   :  { %p422_p1 = pnand %p421_p0, %p415_p11 }
  0x21   :  { %425 = shalt.err (!%p422_p1)
}
  0x22   :  { %34 = dma.hbm_to_vmem [thread:$0]  %s528_s1, 2048, %s29_s27, [#allocation7], %s455_s22, %s455_s22, %s456_s23  }
  0x23   :  { %448 = dma.done.wait [#allocation4], 1024  }
  0x24   :  { %449 = vsyncadd [#allocation4], 4294966272 }
  0x25   :  { %450 = dma.done.wait [#allocation7], 2048  }
  0x26   :  { %451 = vsyncadd [#allocation7], 4294965248  ;;  %v71_v0 = vld [vmem:[#allocation6] sm:$0xff]  ;;  %v72_v1 = vld [vmem:[#allocation6 + $0x8] sm:$0xff]  ;;  %s458_s11 = smov [#allocation8]  }
  0x27   :  { %v73_v2 = vld [vmem:[#allocation6 + $0x10] sm:$0xff]  ;;  %v329_v3 = vpack.c.bf16 %v72_v1, %v71_v0  ;;  %v74_v4 = vld [vmem:[#allocation6 + $0x18] sm:$0xff]  ;;  %v75_v6 = vld [vmem:[#allocation6 + $0x20] sm:$0xff]  ;;  %s247_s12 = sshll.u32 %s458_s11, 4  ;;  %s248_s12 = int_to_ptr.vmem [resolvable:$true] %s247_s12 }
  0x28   :  { %v333_v5 = vpack.c.bf16 %v74_v4, %v73_v2  ;;  %v76_v7 = vld [vmem:[#allocation6 + $0x28] sm:$0xff]  ;;  %v63_v9 = vld [vmem:[#allocation3] sm:$0xff]  ;;  %v77_v11 = vld [vmem:[#allocation6 + $0x30] sm:$0xff]  ;;  %p431_p3 = scmp.lt.s32.totalorder %s248_s12, %s248_s12 }
  0x29   :  { %330 = vmatprep.subr.bf16.mxu0 %v329_v3  ;;  %361 = vmatprep.subr.bf16.mxu1 %v329_v3  ;;  %v337_v8 = vpack.c.bf16 %v76_v7, %v75_v6  ;;  %v67_v10 = vld [vmem:[#allocation3 + $0x20] sm:$0xff]  ;;  %v78_v12 = vld [vmem:[#allocation6 + $0x38] sm:$0xff]  ;;  %v80_v15 = vld [vmem:[#allocation6 + $0x48] sm:$0xff] }
  0x2a   :  { %332 = vmatpush3.bf16.msra.mxu0 %v329_v3  ;;  %369 = vmatpush3.bf16.msra.mxu1 %v329_v3  ;;  %v341_v13 = vpack.c.bf16 %v78_v12, %v77_v11  ;;  %v79_v14 = vld [vmem:[#allocation6 + $0x40] sm:$0xff]  ;;  %v81_v17 = vld [vmem:[#allocation6 + $0x50] sm:$0xff]  ;;  %v82_v18 = vld [vmem:[#allocation6 + $0x58] sm:$0xff] }
  0x2b   :  { %334 = vmatprep.subr.bf16.mxu0 %v333_v5  ;;  %362 = vmatprep.subr.bf16.mxu1 %v333_v5  ;;  %v345_v16 = vpack.c.bf16 %v80_v15, %v79_v14  ;;  %v349_v19 = vpack.c.bf16 %v82_v18, %v81_v17  ;;  %v83_v20 = vld [vmem:[#allocation6 + $0x60] sm:$0xff]  ;;  %v84_v21 = vld [vmem:[#allocation6 + $0x68] sm:$0xff]  ;;  %v85_v23 = vld [vmem:[#allocation6 + $0x70] sm:$0xff] }
  0x2c   :  { %317 = vmatprep.mubr.f32.mxu0 %v63_v9  ;;  %323 = vmatprep.mubr.f32.mxu1 %v67_v10  ;;  %v353_v22 = vpack.c.bf16 %v84_v21, %v83_v20  ;;  %v86_v24 = vld [vmem:[#allocation6 + $0x78] sm:$0xff]  ;;  %v64_v26 = vld [vmem:[#allocation3 + $0x8] sm:$0xff]  ;;  %v65_v28 = vld [vmem:[#allocation3 + $0x10] sm:$0xff] }
  0x2d   :  { %v357_v25 = vpack.c.bf16 %v86_v24, %v85_v23  ;;  %v68_v27 = vld [vmem:[#allocation3 + $0x28] sm:$0xff]  ;;  %v69_v29 = vld [vmem:[#allocation3 + $0x30] sm:$0xff]  ;;  %v66_v30 = vld [vmem:[#allocation3 + $0x18] sm:$0xff] }
  0x2e   :  { %336 = vmatpush3.bf16.msra.mxu0 %v333_v5  ;;  %370 = vmatpush3.bf16.msra.mxu1 %v333_v5  ;;  %v70_v31 = vld [vmem:[#allocation3 + $0x38] sm:$0xff]  ;;  %v260_v32 = vld [vmem:[%s529_s2] ss:$0 sm:$0xff]  ;;  %s426_s2 = scalar_lea.vmem %s248_s12, 1024 }
  0x2f   :  { %338 = vmatprep.subr.bf16.mxu0 %v337_v8  ;;  %363 = vmatprep.subr.bf16.mxu1 %v337_v8  ;;  %p427_p2 = scmp.ne.s32.totalorder %s248_s12, %s426_s2  ;;  %p432_p4 = scmp.lt.s32.totalorder %s426_s2, %s426_s2 }
  0x31   :  { %p433_p5 = por %p432_p4, %p431_p3 }
  0x32   :  { %340 = vmatpush3.bf16.msra.mxu0 %v337_v8  ;;  %371 = vmatpush3.bf16.msra.mxu1 %v337_v8 }
  0x33   :  { %342 = vmatprep.subr.bf16.mxu0 %v341_v13  ;;  %364 = vmatprep.subr.bf16.mxu1 %v341_v13  ;;  %p434_p6 = pnand %p433_p5, %p427_p2 }
  0x36   :  { %344 = vmatpush3.bf16.msra.mxu0 %v341_v13  ;;  %372 = vmatpush3.bf16.msra.mxu1 %v341_v13 }
  0x37   :  { %346 = vmatprep.subr.bf16.mxu0 %v345_v16  ;;  %365 = vmatprep.subr.bf16.mxu1 %v345_v16 }
  0x3a   :  { %348 = vmatpush3.bf16.msra.mxu0 %v345_v16  ;;  %373 = vmatpush3.bf16.msra.mxu1 %v345_v16 }
  0x3b   :  { %350 = vmatprep.subr.bf16.mxu0 %v349_v19  ;;  %366 = vmatprep.subr.bf16.mxu1 %v349_v19 }
  0x3e   :  { %352 = vmatpush3.bf16.msra.mxu0 %v349_v19  ;;  %374 = vmatpush3.bf16.msra.mxu1 %v349_v19 }
  0x3f   :  { %354 = vmatprep.subr.bf16.mxu0 %v353_v22  ;;  %367 = vmatprep.subr.bf16.mxu1 %v353_v22 }
  0x42   :  { %356 = vmatpush3.bf16.msra.mxu0 %v353_v22  ;;  %375 = vmatpush3.bf16.msra.mxu1 %v353_v22 }
  0x43   :  { %358 = vmatprep.subr.bf16.mxu0 %v357_v25  ;;  %368 = vmatprep.subr.bf16.mxu1 %v357_v25 }
  0x46   :  { %360 = vmatpush3.bf16.msra.mxu0 %v357_v25  ;;  %376 = vmatpush3.bf16.msra.mxu1 %v357_v25 }
  0x49   :  { %318 = vmatmul.mubr.f32.vlgmr.msra.gmra.mrb[0].mxu0 %v64_v26  ;;  %324 = vmatmul.mubr.f32.vlgmr.msra.gmra.mrb[0].mxu1 %v68_v27 }
  0x4a   :  { %320 = vmatprep.mubr.f32.mxu0 %v65_v28  ;;  %326 = vmatprep.mubr.f32.mxu1 %v69_v29 }
  0x4d   :  { %321 = vmatmul.mubr.f32.gmra.mrb[2].mxu0 %v66_v30  ;;  %327 = vmatmul.mubr.f32.gmra.mrb[2].mxu1 %v70_v31 }
 0x11c   :  { %v319_v33 = vpop.f32.mrb[0].mxu0  ;;  %v325_v34 = vpop.f32.mrb[0].mxu1 }
 0x11d   :  { %v227_v35 = vadd.f32 %v319_v33, %v260_v32  ;;  %v231_v36 = vadd.f32 %v325_v34, %v260_v32  ;;  %v153_v37 = vpop.f32.mrb[1].mxu0  ;;  %v173_v38 = vpop.f32.mrb[1].mxu1 }
 0x11e   :  { %v226_v39 = vadd.f32 %v260_v32, %v153_v37  ;;  %v230_v40 = vadd.f32 %v260_v32, %v173_v38 }
 0x11f   :  { %235 = vst [vmem:[#allocation8 + $0x8] sm:$0xff] %v227_v35  ;;  %239 = vst [vmem:[#allocation8 + $0x28] sm:$0xff] %v231_v36 }
 0x120   :  { %234 = vst [vmem:[#allocation8] sm:$0xff] %v226_v39  ;;  %238 = vst [vmem:[#allocation8 + $0x20] sm:$0xff] %v230_v40  ;;  %v322_v41 = vpop.f32.mrb[2].mxu0  ;;  %v328_v42 = vpop.f32.mrb[2].mxu1 }
 0x121   :  { %v229_v43 = vadd.f32 %v322_v41, %v260_v32  ;;  %v233_v44 = vadd.f32 %v328_v42, %v260_v32  ;;  %v163_v45 = vpop.f32.mrb[3].mxu0  ;;  %v183_v46 = vpop.f32.mrb[3].mxu1 }
 0x122   :  { %v228_v47 = vadd.f32 %v260_v32, %v163_v45  ;;  %v232_v48 = vadd.f32 %v260_v32, %v183_v46 }
 0x123   :  { %237 = vst [vmem:[#allocation8 + $0x18] sm:$0xff] %v229_v43  ;;  %241 = vst [vmem:[#allocation8 + $0x38] sm:$0xff] %v233_v44 }
 0x124   :  { %236 = vst [vmem:[#allocation8 + $0x10] sm:$0xff] %v228_v47  ;;  %240 = vst [vmem:[#allocation8 + $0x30] sm:$0xff] %v232_v48 }
 0x125   :  { %437 = shalt.err (!%p434_p6)
}
 0x126   :  { %s438_s15 = scalar_lea.hbm %s530_s3, 1024 }
 0x127   :  { %p439_p7 = scmp.ne.s32.totalorder %s530_s3, %s438_s15  ;;  %p442_p8 = scmp.lt.u32.totalorder %s438_s15, %s530_s3 }
 0x129   :  { %p444_p9 = pnand %p442_p8, %p439_p7 }
 0x12b   :  { %447 = shalt.err (!%p444_p9)
}
 0x12c   :  { %253 = dma.vmem_to_hbm [thread:$0]  %s248_s12, 1024, %s530_s3, [#allocation5], %s455_s22, %s455_s22, %s456_s23  }
 0x12d   :  { %452 = dma.done.wait [#allocation5], 1024  }
 0x12e   :  { %453 = vsyncadd [#allocation5], 4294966272 }
 0x12f   :  { %257 = vsyncpa [#allocation4], 1 }
 0x130   :  { %258 = vsyncpa [#allocation7], 1 }
 0x131   :  { %259 = vsyncpa [#allocation5], 1 }

</bundles_post_ra>
